<compile_context>
chip_gen: v7x
topology: tpu7x:2x2x1
jax: 0.10.0
libtpu: 0.0.40
codegen_flags: <defaults>
</compile_context>

<pallas_src>
import functools

import jax
import jax.numpy as jnp
from jax.experimental import pallas as pl
from jax.experimental.pallas import tpu as pltpu


def _lrelu(x, slope=0.2):
    return jnp.where(x > 0, x, slope * x)


def _round_up(x, m):
    return -(-x // m) * m


def _vmem_capacity_bytes():
    try:
        info = pltpu.get_tpu_info()
        cap = getattr(info, "vmem_capacity_bytes", None)
        if cap:
            return int(cap)
    except Exception:
        pass
    return 64 << 20          # conservative (v7x-sized) default


def _rdb_kernel(n_dilated, growth, c_in, t_len, front, period, b_tile, guard,
                *refs):
    """refs = x_ref, (w_i, b_i)*n_dilated, w_fin, b_fin, out_ref, slab."""
    x_ref = refs[0]
    layer_refs = refs[1:1 + 2 * n_dilated]
    w_fin_ref = refs[-4]
    b_fin_ref = refs[-3]
    out_ref = refs[-2]
    slab = refs[-1]

    g = guard                                  # top guard rows (never read by real rows)
    rows = b_tile * period                     # compute rows (incl. per-batch halos)
    tail = period - front - t_len
    t_pad = out_ref.shape[1]

    # ---- stage x (bf16) and zero the per-batch halo rows of the x columns ----
    # The scratch persists across grid steps (and is per-core on megacore), so
    # the halo rows are re-zeroed every step; they ARE Conv1d's zero padding.
    zf = jnp.zeros((front, c_in), jnp.bfloat16)
    zt = jnp.zeros((tail, c_in), jnp.bfloat16)
    for b in range(b_tile):
        r0 = g + b * period
        slab[r0:r0 + front, 0:c_in] = zf
        slab[r0 + front:r0 + front + t_len, 0:c_in] = (
            x_ref[b].astype(jnp.bfloat16))
        slab[r0 + front + t_len:r0 + period, 0:c_in] = zt

    # Row-validity mask: True for real time steps, False for halo/align rows.
    ridx = jax.lax.broadcasted_iota(jnp.int32, (rows, 1), 0)
    local = ridx % period
    valid = jnp.logical_and(local >= front, local < front + t_len)

    # ---- dilated dense layers: 3 accumulating matmuls on shifted views ----
    for i in range(n_dilated):
        d = 2 ** i
        cin = c_in + i * growth
        w_ref = layer_refs[2 * i]              # (3, cin, growth)  bf16
        bias = layer_refs[2 * i + 1][...]      # (1, growth)       f32
        a_m = slab[g - d:g - d + rows, 0:cin]      # x[t - d]
        a_0 = slab[g:g + rows, 0:cin]              # x[t]
        a_p = slab[g + d:g + d + rows, 0:cin]      # x[t + d]
        acc = jnp.dot(a_m, w_ref[0], preferred_element_type=jnp.float32)
        acc = acc + jnp.dot(a_0, w_ref[1], preferred_element_type=jnp.float32)
        acc = acc + jnp.dot(a_p, w_ref[2], preferred_element_type=jnp.float32)
        y = _lrelu(acc + bias)
        y = jnp.where(valid, y, 0.0)           # halo rows stay exactly zero
        slab[g:g + rows, cin:cin + growth] = y.astype(jnp.bfloat16)

    # ---- fused conv_last + 1x1 shortcut epilogue ----
    feats = slab[g:g + rows, :]                # (rows, c_total) bf16
    y = jnp.dot(feats, w_fin_ref[...], preferred_element_type=jnp.float32)
    y = _lrelu(y + b_fin_ref[...])
    for b in range(b_tile):
        r0 = b * period + front                # multiple of 8 -> dense store
        out_ref[b, :, :] = y[r0:r0 + t_pad, :].astype(out_ref.dtype)


def residual_dense_block(x_btc, params, *, b_tile=None):
    """x_btc: (B, T, C) float32. Returns (B, T, C) float32."""
    B, T, C = x_btc.shape
    n_dilated = len(params["dilated"])
    growth = params["dilated"][0][0].shape[2]
    halo = 2 ** (n_dilated - 1)
    c_total = C + n_dilated * growth

    cp = _round_up(C, 128)                     # lane-dense output channels
    t_pad = _round_up(T, 8)                    # sublane-dense output time
    front = _round_up(halo, 8)                 # per-batch leading zero rows
    period = front + _round_up(T + halo, 8)    # per-batch slab rows (>= front+t_pad)
    guard = _round_up(halo, 16)                # slab guard rows (top & bottom)
    c_pad = _round_up(c_total, 128)

    # ---- per-step VMEM footprint with real lane/sublane padding ----
    w_bytes = 0
    for i in range(n_dilated):
        cin = C + i * growth
        w_bytes += 3 * _round_up(cin, 16) * _round_up(growth, 128) * 2
        w_bytes += 8 * _round_up(growth, 128) * 4
    w_bytes += _round_up(c_total, 16) * cp * 2 + 8 * cp * 4

    def vmem_bytes(bt):
        rows = bt * period
        slab = _round_up(2 * guard + rows, 16) * c_pad * 2     # bf16 slab (1 copy)
        x_in = 2 * bt * t_pad * _round_up(C, 128) * 4          # dbl-buffered input
        out_b = 2 * bt * t_pad * cp * 4                        # dbl-buffered output
        tmp = rows * cp * 4 + 4 * rows * c_pad * 2             # f32/bf16 temporaries
        return slab + x_in + out_b + tmp + 2 * w_bytes

    vmem_cap = _vmem_capacity_bytes()          # 128 MiB on v5e/v6e, 64 MiB on v7x
    budget = int(vmem_cap * 0.70)
    if b_tile is None:
        b_tile_cap = max(1, -(-B // 2))        # >= 2 grid steps for v7x megacore
        per_bt = max(1, vmem_bytes(2) - vmem_bytes(1))
        bt = int(min(b_tile_cap, max(1, (budget - 2 * w_bytes) // per_bt)))
        while bt > 1 and vmem_bytes(bt) > budget:
            bt -= 1
        b_tile = bt
    b_pad = _round_up(B, b_tile)
    grid = (b_pad // b_tile,)

    # ---- wrapper-side layout plumbing (no time padding of x) ----
    x = x_btc.astype(jnp.float32)
    if b_pad != B:
        x = jnp.pad(x, ((0, b_pad - B), (0, 0), (0, 0)))

    args = [x]
    in_specs = [pl.BlockSpec((b_tile, T, C), lambda i: (i, 0, 0))]

    for (w, b) in params["dilated"]:
        wk = w.astype(jnp.bfloat16)                        # (3, cin, growth)
        bk = b.astype(jnp.float32)                         # (1, growth)
        args += [wk, bk]
        in_specs += [pl.BlockSpec(wk.shape, lambda i: (0, 0, 0)),
                     pl.BlockSpec(bk.shape, lambda i: (0, 0))]

    wl, bl = params["last"]
    ws, bs = params["shortcut"]
    w_fin = wl.at[:C, :].add(ws)                           # fold 1x1 shortcut
    w_fin = jnp.pad(w_fin, ((0, 0), (0, cp - C))).astype(jnp.bfloat16)
    b_fin = jnp.pad(bl + bs, ((0, 0), (0, cp - C))).astype(jnp.float32)
    args += [w_fin, b_fin]
    in_specs += [pl.BlockSpec(w_fin.shape, lambda i: (0, 0)),
                 pl.BlockSpec(b_fin.shape, lambda i: (0, 0))]

    # ---- advisory cost estimate for XLA scheduling ----
    rows_all = b_pad * period
    flops = 2 * rows_all * c_total * cp
    for i in range(n_dilated):
        flops += 3 * 2 * rows_all * (C + i * growth) * growth
    bytes_accessed = (x.size * 4 + b_pad * t_pad * cp * 4
                      + sum(int(a.size) * a.dtype.itemsize for a in args[1:]))

    kernel = functools.partial(_rdb_kernel, n_dilated, growth, C, T,
                               front, period, b_tile, guard)

    out = pl.pallas_call(
        kernel,
        out_shape=jax.ShapeDtypeStruct((b_pad, t_pad, cp), jnp.float32),
        grid=grid,
        in_specs=in_specs,
        out_specs=pl.BlockSpec((b_tile, t_pad, cp), lambda i: (i, 0, 0)),
        scratch_shapes=[pltpu.VMEM((2 * guard + b_tile * period, c_total),
                                   jnp.bfloat16)],
        compiler_params=pltpu.CompilerParams(
            dimension_semantics=("parallel",),
            vmem_limit_bytes=int(vmem_cap * 0.80)),
        cost_estimate=pl.CostEstimate(flops=int(flops), transcendentals=0,
                                      bytes_accessed=int(bytes_accessed)),
    )(*args)

    # TODO(synk): emit bf16 / keep the cp-padded width if the consumer permits
    # (halves writeback HBM traffic and removes this slicing pass).
    return out[:B, :T, :C]


def init_params(key, channels, growth, n_dilated):
    """Deterministic kaiming-normal init (leaky_relu gain), zero biases."""
    params = {"dilated": []}
    keys = jax.random.split(key, n_dilated + 2)
    gain = 2.0 ** 0.5
    in_ch = channels
    for i in range(n_dilated):
        fan_in = in_ch * 3                        # in_channels * kernel_size
        std = gain / (fan_in ** 0.5)
        w = jax.random.normal(keys[i], (3, in_ch, growth), jnp.float32) * std
        b = jnp.zeros((1, growth), jnp.float32)
        params["dilated"].append((w, b))
        in_ch += growth
    std = gain / (in_ch ** 0.5)                   # conv_last: 1x1, in_ch -> channels
    params["last"] = (
        jax.random.normal(keys[n_dilated], (in_ch, channels), jnp.float32) * std,
        jnp.zeros((1, channels), jnp.float32),
    )
    std = gain / (channels ** 0.5)                # shortcut: 1x1, channels -> channels
    params["shortcut"] = (
        jax.random.normal(keys[n_dilated + 1], (channels, channels), jnp.float32) * std,
        jnp.zeros((1, channels), jnp.float32),
    )
    return params


def reference_jax(x_btc, params):
    """Pure-JAX reference (independent of the kernel's slab/weight packing).

    Uses the same bf16-operand / fp32-accumulate matmul numerics as the kernel.
    """
    def per_batch(x):
        T = x.shape[0]
        cat = x
        for i, (w, b) in enumerate(params["dilated"]):
            d = 2 ** i
            zpad = jnp.zeros((d, cat.shape[1]), x.dtype)
            x_m = jnp.concatenate([zpad, cat[:T - d]], axis=0)
            x_p = jnp.concatenate([cat[d:], zpad], axis=0)
            wb = w.astype(jnp.bfloat16)
            out = (jnp.dot(x_m.astype(jnp.bfloat16), wb[0],
                           preferred_element_type=jnp.float32)
                   + jnp.dot(cat.astype(jnp.bfloat16), wb[1],
                             preferred_element_type=jnp.float32)
                   + jnp.dot(x_p.astype(jnp.bfloat16), wb[2],
                             preferred_element_type=jnp.float32)
                   + b)
            out = _lrelu(out)
            cat = jnp.concatenate([cat, out], axis=1)
        wl, bl = params["last"]
        ws, bs = params["shortcut"]
        y = (jnp.dot(cat.astype(jnp.bfloat16), wl.astype(jnp.bfloat16),
                     preferred_element_type=jnp.float32) + bl
             + jnp.dot(x.astype(jnp.bfloat16), ws.astype(jnp.bfloat16),
                       preferred_element_type=jnp.float32) + bs)
        return _lrelu(y)
    return jax.vmap(per_batch)(x_btc)


if __name__ == "__main__":
    B, C, T = 2, 4, 16          # batch, channels, time (PyTorch input: (B, C, T))
    GROWTH, N_DILATED = 8, 3

    key = jax.random.PRNGKey(0)
    kx, kp = jax.random.split(key)
    x_bct = jax.random.normal(kx, (B, C, T), jnp.float32)     # PyTorch NCW layout
    x_btc = jnp.transpose(x_bct, (0, 2, 1))                    # kernel layout (B, T, C)

    params = init_params(kp, C, GROWTH, N_DILATED)

    out = jax.block_until_ready(residual_dense_block(x_btc, params))
    ref = jax.block_until_ready(reference_jax(x_btc, params))

    assert out.shape == (B, T, C)
    # Tolerance covers bf16 operand rounding + tap/shortcut fusion order diffs.
    assert jnp.allclose(out, ref, atol=3e-2, rtol=3e-2), (
        f"kernel != reference, max abs diff = {jnp.max(jnp.abs(out - ref))}")

    _ = jnp.transpose(out, (0, 2, 1))   # back to PyTorch (B, C, T) if needed

    print("KERNEL_OK")
</pallas_src>

<mosaic_0001>
module attributes {stable_mosaic.version = 11 : i64} {
  func.func @_rdb_kernel(%arg0: i32, %arg1: memref<1x16x4xf32, #tpu.memory_space<vmem>>, %arg2: memref<3x4x8xbf16, #tpu.memory_space<vmem>>, %arg3: memref<1x8xf32, #tpu.memory_space<vmem>>, %arg4: memref<3x12x8xbf16, #tpu.memory_space<vmem>>, %arg5: memref<1x8xf32, #tpu.memory_space<vmem>>, %arg6: memref<3x20x8xbf16, #tpu.memory_space<vmem>>, %arg7: memref<1x8xf32, #tpu.memory_space<vmem>>, %arg8: memref<28x128xbf16, #tpu.memory_space<vmem>>, %arg9: memref<1x128xf32, #tpu.memory_space<vmem>>, %arg10: memref<1x16x128xf32, #tpu.memory_space<vmem>>, %arg11: memref<64x28xbf16, #tpu.memory_space<vmem>>) attributes {dimension_semantics = [#tpu.dimension_semantics<parallel>], iteration_bounds = array<i64: 2>, scalar_prefetch = 0 : i64, scratch_operands = 1 : i64, tpu.core_type = #tpu.core_type<tc>, window_params = [{transform_indices = @transform_0, window_bounds = array<i64: 1, 16, 4>}, {pipeline_mode = #tpu.pipeline_mode<synchronous>, transform_indices = @transform_1, window_bounds = array<i64: 3, 4, 8>}, {pipeline_mode = #tpu.pipeline_mode<synchronous>, transform_indices = @transform_2, window_bounds = array<i64: 1, 8>}, {pipeline_mode = #tpu.pipeline_mode<synchronous>, transform_indices = @transform_3, window_bounds = array<i64: 3, 12, 8>}, {pipeline_mode = #tpu.pipeline_mode<synchronous>, transform_indices = @transform_4, window_bounds = array<i64: 1, 8>}, {pipeline_mode = #tpu.pipeline_mode<synchronous>, transform_indices = @transform_5, window_bounds = array<i64: 3, 20, 8>}, {pipeline_mode = #tpu.pipeline_mode<synchronous>, transform_indices = @transform_6, window_bounds = array<i64: 1, 8>}, {pipeline_mode = #tpu.pipeline_mode<synchronous>, transform_indices = @transform_7, window_bounds = array<i64: 28, 128>}, {pipeline_mode = #tpu.pipeline_mode<synchronous>, transform_indices = @transform_8, window_bounds = array<i64: 1, 128>}, {transform_indices = @transform_9, window_bounds = array<i64: 1, 16, 128>}]} {
    %cst = arith.constant 0.000000e+00 : bf16
    %0 = vector.broadcast %cst : bf16 to vector<8x4xbf16>
    %cst_0 = arith.constant 0.000000e+00 : bf16
    %1 = vector.broadcast %cst_0 : bf16 to vector<8x4xbf16>
    %c16 = arith.constant 16 : index
    %c0 = arith.constant 0 : index
    %2 = vector.load %arg11[%c16, %c0] : memref<64x28xbf16, #tpu.memory_space<vmem>>, vector<8x4xbf16>
    tpu.vector_store %arg11[%c16, %c0], %0 {strides = array<i32>} : memref<64x28xbf16, #tpu.memory_space<vmem>>, vector<8x4xbf16>,
    %c0_1 = arith.constant 0 : index
    %c0_2 = arith.constant 0 : index
    %c0_3 = arith.constant 0 : index
    %3 = vector.load %arg1[%c0_1, %c0_2, %c0_3] : memref<1x16x4xf32, #tpu.memory_space<vmem>>, vector<1x16x4xf32>
    %4 = vector.shape_cast %3 : vector<1x16x4xf32> to vector<16x4xf32>
    %5 = arith.truncf %4 : vector<16x4xf32> to vector<16x4xbf16>
    %c24 = arith.constant 24 : index
    %c0_4 = arith.constant 0 : index
    %6 = vector.load %arg11[%c24, %c0_4] : memref<64x28xbf16, #tpu.memory_space<vmem>>, vector<16x4xbf16>
    tpu.vector_store %arg11[%c24, %c0_4], %5 {strides = array<i32>} : memref<64x28xbf16, #tpu.memory_space<vmem>>, vector<16x4xbf16>,
    %c40 = arith.constant 40 : index
    %c0_5 = arith.constant 0 : index
    %7 = vector.load %arg11[%c40, %c0_5] : memref<64x28xbf16, #tpu.memory_space<vmem>>, vector<8x4xbf16>
    tpu.vector_store %arg11[%c40, %c0_5], %1 {strides = array<i32>} : memref<64x28xbf16, #tpu.memory_space<vmem>>, vector<8x4xbf16>,
    %8 = tpu.iota {dimensions = array<i32: 0>} : vector<32x1xi32>
    %c32_i32 = arith.constant 32 : i32
    %c0_i32 = arith.constant 0 : i32
    %9 = arith.cmpi eq, %c32_i32, %c0_i32 : i32
    %c1_i32 = arith.constant 1 : i32
    %10 = arith.select %9, %c1_i32, %c32_i32 : i32
    %11 = vector.broadcast %10 : i32 to vector<32x1xi32>
    %12 = arith.remsi %8, %11 : vector<32x1xi32>
    %c0_i32_6 = arith.constant 0 : i32
    %13 = vector.broadcast %c0_i32_6 : i32 to vector<32x1xi32>
    %14 = arith.cmpi ne, %12, %13 : vector<32x1xi32>
    %c0_i32_7 = arith.constant 0 : i32
    %15 = vector.broadcast %c0_i32_7 : i32 to vector<32x1xi32>
    %16 = arith.cmpi slt, %12, %15 : vector<32x1xi32>
    %c0_i32_8 = arith.constant 0 : i32
    %17 = arith.cmpi slt, %10, %c0_i32_8 : i32
    %18 = vector.broadcast %17 : i1 to vector<32x1xi1>
    %19 = vector.broadcast %18 : vector<32x1xi1> to vector<32x1xi1>
    %20 = arith.xori %16, %19 : vector<32x1xi1>
    %21 = arith.andi %20, %14 : vector<32x1xi1>
    %22 = vector.broadcast %10 : i32 to vector<32x1xi32>
    %23 = arith.addi %12, %22 : vector<32x1xi32>
    %24 = arith.select %21, %23, %12 : vector<32x1xi1>, vector<32x1xi32>
    %c8_i32 = arith.constant 8 : i32
    %25 = vector.broadcast %c8_i32 : i32 to vector<32x1xi32>
    %26 = arith.cmpi sge, %24, %25 : vector<32x1xi32>
    %c24_i32 = arith.constant 24 : i32
    %27 = vector.broadcast %c24_i32 : i32 to vector<32x1xi32>
    %28 = arith.cmpi slt, %24, %27 : vector<32x1xi32>
    %29 = arith.andi %26, %28 : vector<32x1xi1>
    %c0_9 = arith.constant 0 : index
    %c0_10 = arith.constant 0 : index
    %30 = vector.load %arg3[%c0_9, %c0_10] : memref<1x8xf32, #tpu.memory_space<vmem>>, vector<1x8xf32>
    %c15 = arith.constant 15 : index
    %c0_11 = arith.constant 0 : index
    %31 = vector.load %arg11[%c15, %c0_11] : memref<64x28xbf16, #tpu.memory_space<vmem>>, vector<32x4xbf16>
    %c16_12 = arith.constant 16 : index
    %c0_13 = arith.constant 0 : index
    %32 = vector.load %arg11[%c16_12, %c0_13] : memref<64x28xbf16, #tpu.memory_space<vmem>>, vector<32x4xbf16>
    %c17 = arith.constant 17 : index
    %c0_14 = arith.constant 0 : index
    %33 = vector.load %arg11[%c17, %c0_14] : memref<64x28xbf16, #tpu.memory_space<vmem>>, vector<32x4xbf16>
    %c0_15 = arith.constant 0 : index
    %c0_16 = arith.constant 0 : index
    %c0_17 = arith.constant 0 : index
    %34 = vector.load %arg2[%c0_15, %c0_16, %c0_17] : memref<3x4x8xbf16, #tpu.memory_space<vmem>>, vector<1x4x8xbf16>
    %35 = vector.shape_cast %34 : vector<1x4x8xbf16> to vector<4x8xbf16>
    %cst_18 = arith.constant dense<0.000000e+00> : vector<32x8xf32>
    %36 = tpu.matmul %31, %35, %cst_18 {dimension_numbers = #tpu.dot_dimension_numbers<[1], [0], [0], [1], [0, 0, 1, 1], [], []>} : vector<32x4xbf16>, vector<4x8xbf16>, vector<32x8xf32> -> vector<32x8xf32>
    %c1 = arith.constant 1 : index
    %c0_19 = arith.constant 0 : index
    %c0_20 = arith.constant 0 : index
    %37 = vector.load %arg2[%c1, %c0_19, %c0_20] : memref<3x4x8xbf16, #tpu.memory_space<vmem>>, vector<1x4x8xbf16>
    %38 = vector.shape_cast %37 : vector<1x4x8xbf16> to vector<4x8xbf16>
    %cst_21 = arith.constant dense<0.000000e+00> : vector<32x8xf32>
    %39 = tpu.matmul %32, %38, %cst_21 {dimension_numbers = #tpu.dot_dimension_numbers<[1], [0], [0], [1], [0, 0, 1, 1], [], []>} : vector<32x4xbf16>, vector<4x8xbf16>, vector<32x8xf32> -> vector<32x8xf32>
    %40 = arith.addf %36, %39 : vector<32x8xf32>
    %c2 = arith.constant 2 : index
    %c0_22 = arith.constant 0 : index
    %c0_23 = arith.constant 0 : index
    %41 = vector.load %arg2[%c2, %c0_22, %c0_23] : memref<3x4x8xbf16, #tpu.memory_space<vmem>>, vector<1x4x8xbf16>
    %42 = vector.shape_cast %41 : vector<1x4x8xbf16> to vector<4x8xbf16>
    %cst_24 = arith.constant dense<0.000000e+00> : vector<32x8xf32>
    %43 = tpu.matmul %33, %42, %cst_24 {dimension_numbers = #tpu.dot_dimension_numbers<[1], [0], [0], [1], [0, 0, 1, 1], [], []>} : vector<32x4xbf16>, vector<4x8xbf16>, vector<32x8xf32> -> vector<32x8xf32>
    %44 = arith.addf %40, %43 : vector<32x8xf32>
    %45 = vector.broadcast %30 : vector<1x8xf32> to vector<32x8xf32>
    %46 = arith.addf %44, %45 : vector<32x8xf32>
    %cst_25 = arith.constant 0.000000e+00 : f32
    %47 = vector.broadcast %cst_25 : f32 to vector<32x8xf32>
    %48 = arith.cmpf ogt, %46, %47 : vector<32x8xf32>
    %cst_26 = arith.constant 2.000000e-01 : f32
    %49 = vector.broadcast %cst_26 : f32 to vector<32x8xf32>
    %50 = arith.mulf %49, %46 : vector<32x8xf32>
    %51 = arith.select %48, %46, %50 : vector<32x8xi1>, vector<32x8xf32>
    %cst_27 = arith.constant 0.000000e+00 : f32
    %52 = vector.shape_cast %29 : vector<32x1xi1> to vector<32x1xi1>
    %53 = vector.broadcast %52 : vector<32x1xi1> to vector<32x8xi1>
    %54 = vector.broadcast %cst_27 : f32 to vector<32x8xf32>
    %55 = arith.select %53, %51, %54 : vector<32x8xi1>, vector<32x8xf32>
    %56 = arith.truncf %55 : vector<32x8xf32> to vector<32x8xbf16>
    %c16_28 = arith.constant 16 : index
    %c4 = arith.constant 4 : index
    %57 = vector.load %arg11[%c16_28, %c4] : memref<64x28xbf16, #tpu.memory_space<vmem>>, vector<32x8xbf16>
    tpu.vector_store %arg11[%c16_28, %c4], %56 {strides = array<i32>} : memref<64x28xbf16, #tpu.memory_space<vmem>>, vector<32x8xbf16>,
    %c0_29 = arith.constant 0 : index
    %c0_30 = arith.constant 0 : index
    %58 = vector.load %arg5[%c0_29, %c0_30] : memref<1x8xf32, #tpu.memory_space<vmem>>, vector<1x8xf32>
    %c14 = arith.constant 14 : index
    %c0_31 = arith.constant 0 : index
    %59 = vector.load %arg11[%c14, %c0_31] : memref<64x28xbf16, #tpu.memory_space<vmem>>, vector<32x12xbf16>
    %c16_32 = arith.constant 16 : index
    %c0_33 = arith.constant 0 : index
    %60 = vector.load %arg11[%c16_32, %c0_33] : memref<64x28xbf16, #tpu.memory_space<vmem>>, vector<32x12xbf16>
    %c18 = arith.constant 18 : index
    %c0_34 = arith.constant 0 : index
    %61 = vector.load %arg11[%c18, %c0_34] : memref<64x28xbf16, #tpu.memory_space<vmem>>, vector<32x12xbf16>
    %c0_35 = arith.constant 0 : index
    %c0_36 = arith.constant 0 : index
    %c0_37 = arith.constant 0 : index
    %62 = vector.load %arg4[%c0_35, %c0_36, %c0_37] : memref<3x12x8xbf16, #tpu.memory_space<vmem>>, vector<1x12x8xbf16>
    %63 = vector.shape_cast %62 : vector<1x12x8xbf16> to vector<12x8xbf16>
    %cst_38 = arith.constant dense<0.000000e+00> : vector<32x8xf32>
    %64 = tpu.matmul %59, %63, %cst_38 {dimension_numbers = #tpu.dot_dimension_numbers<[1], [0], [0], [1], [0, 0, 1, 1], [], []>} : vector<32x12xbf16>, vector<12x8xbf16>, vector<32x8xf32> -> vector<32x8xf32>
    %c1_39 = arith.constant 1 : index
    %c0_40 = arith.constant 0 : index
    %c0_41 = arith.constant 0 : index
    %65 = vector.load %arg4[%c1_39, %c0_40, %c0_41] : memref<3x12x8xbf16, #tpu.memory_space<vmem>>, vector<1x12x8xbf16>
    %66 = vector.shape_cast %65 : vector<1x12x8xbf16> to vector<12x8xbf16>
    %cst_42 = arith.constant dense<0.000000e+00> : vector<32x8xf32>
    %67 = tpu.matmul %60, %66, %cst_42 {dimension_numbers = #tpu.dot_dimension_numbers<[1], [0], [0], [1], [0, 0, 1, 1], [], []>} : vector<32x12xbf16>, vector<12x8xbf16>, vector<32x8xf32> -> vector<32x8xf32>
    %68 = arith.addf %64, %67 : vector<32x8xf32>
    %c2_43 = arith.constant 2 : index
    %c0_44 = arith.constant 0 : index
    %c0_45 = arith.constant 0 : index
    %69 = vector.load %arg4[%c2_43, %c0_44, %c0_45] : memref<3x12x8xbf16, #tpu.memory_space<vmem>>, vector<1x12x8xbf16>
    %70 = vector.shape_cast %69 : vector<1x12x8xbf16> to vector<12x8xbf16>
    %cst_46 = arith.constant dense<0.000000e+00> : vector<32x8xf32>
    %71 = tpu.matmul %61, %70, %cst_46 {dimension_numbers = #tpu.dot_dimension_numbers<[1], [0], [0], [1], [0, 0, 1, 1], [], []>} : vector<32x12xbf16>, vector<12x8xbf16>, vector<32x8xf32> -> vector<32x8xf32>
    %72 = arith.addf %68, %71 : vector<32x8xf32>
    %73 = vector.broadcast %58 : vector<1x8xf32> to vector<32x8xf32>
    %74 = arith.addf %72, %73 : vector<32x8xf32>
    %cst_47 = arith.constant 0.000000e+00 : f32
    %75 = vector.broadcast %cst_47 : f32 to vector<32x8xf32>
    %76 = arith.cmpf ogt, %74, %75 : vector<32x8xf32>
    %cst_48 = arith.constant 2.000000e-01 : f32
    %77 = vector.broadcast %cst_48 : f32 to vector<32x8xf32>
    %78 = arith.mulf %77, %74 : vector<32x8xf32>
    %79 = arith.select %76, %74, %78 : vector<32x8xi1>, vector<32x8xf32>
    %cst_49 = arith.constant 0.000000e+00 : f32
    %80 = vector.shape_cast %29 : vector<32x1xi1> to vector<32x1xi1>
    %81 = vector.broadcast %80 : vector<32x1xi1> to vector<32x8xi1>
    %82 = vector.broadcast %cst_49 : f32 to vector<32x8xf32>
    %83 = arith.select %81, %79, %82 : vector<32x8xi1>, vector<32x8xf32>
    %84 = arith.truncf %83 : vector<32x8xf32> to vector<32x8xbf16>
    %c16_50 = arith.constant 16 : index
    %c12 = arith.constant 12 : index
    %85 = vector.load %arg11[%c16_50, %c12] : memref<64x28xbf16, #tpu.memory_space<vmem>>, vector<32x8xbf16>
    tpu.vector_store %arg11[%c16_50, %c12], %84 {strides = array<i32>} : memref<64x28xbf16, #tpu.memory_space<vmem>>, vector<32x8xbf16>,
    %c0_51 = arith.constant 0 : index
    %c0_52 = arith.constant 0 : index
    %86 = vector.load %arg7[%c0_51, %c0_52] : memref<1x8xf32, #tpu.memory_space<vmem>>, vector<1x8xf32>
    %c12_53 = arith.constant 12 : index
    %c0_54 = arith.constant 0 : index
    %87 = vector.load %arg11[%c12_53, %c0_54] : memref<64x28xbf16, #tpu.memory_space<vmem>>, vector<32x20xbf16>
    %c16_55 = arith.constant 16 : index
    %c0_56 = arith.constant 0 : index
    %88 = vector.load %arg11[%c16_55, %c0_56] : memref<64x28xbf16, #tpu.memory_space<vmem>>, vector<32x20xbf16>
    %c20 = arith.constant 20 : index
    %c0_57 = arith.constant 0 : index
    %89 = vector.load %arg11[%c20, %c0_57] : memref<64x28xbf16, #tpu.memory_space<vmem>>, vector<32x20xbf16>
    %c0_58 = arith.constant 0 : index
    %c0_59 = arith.constant 0 : index
    %c0_60 = arith.constant 0 : index
    %90 = vector.load %arg6[%c0_58, %c0_59, %c0_60] : memref<3x20x8xbf16, #tpu.memory_space<vmem>>, vector<1x20x8xbf16>
    %91 = vector.shape_cast %90 : vector<1x20x8xbf16> to vector<20x8xbf16>
    %cst_61 = arith.constant dense<0.000000e+00> : vector<32x8xf32>
    %92 = tpu.matmul %87, %91, %cst_61 {dimension_numbers = #tpu.dot_dimension_numbers<[1], [0], [0], [1], [0, 0, 1, 1], [], []>} : vector<32x20xbf16>, vector<20x8xbf16>, vector<32x8xf32> -> vector<32x8xf32>
    %c1_62 = arith.constant 1 : index
    %c0_63 = arith.constant 0 : index
    %c0_64 = arith.constant 0 : index
    %93 = vector.load %arg6[%c1_62, %c0_63, %c0_64] : memref<3x20x8xbf16, #tpu.memory_space<vmem>>, vector<1x20x8xbf16>
    %94 = vector.shape_cast %93 : vector<1x20x8xbf16> to vector<20x8xbf16>
    %cst_65 = arith.constant dense<0.000000e+00> : vector<32x8xf32>
    %95 = tpu.matmul %88, %94, %cst_65 {dimension_numbers = #tpu.dot_dimension_numbers<[1], [0], [0], [1], [0, 0, 1, 1], [], []>} : vector<32x20xbf16>, vector<20x8xbf16>, vector<32x8xf32> -> vector<32x8xf32>
    %96 = arith.addf %92, %95 : vector<32x8xf32>
    %c2_66 = arith.constant 2 : index
    %c0_67 = arith.constant 0 : index
    %c0_68 = arith.constant 0 : index
    %97 = vector.load %arg6[%c2_66, %c0_67, %c0_68] : memref<3x20x8xbf16, #tpu.memory_space<vmem>>, vector<1x20x8xbf16>
    %98 = vector.shape_cast %97 : vector<1x20x8xbf16> to vector<20x8xbf16>
    %cst_69 = arith.constant dense<0.000000e+00> : vector<32x8xf32>
    %99 = tpu.matmul %89, %98, %cst_69 {dimension_numbers = #tpu.dot_dimension_numbers<[1], [0], [0], [1], [0, 0, 1, 1], [], []>} : vector<32x20xbf16>, vector<20x8xbf16>, vector<32x8xf32> -> vector<32x8xf32>
    %100 = arith.addf %96, %99 : vector<32x8xf32>
    %101 = vector.broadcast %86 : vector<1x8xf32> to vector<32x8xf32>
    %102 = arith.addf %100, %101 : vector<32x8xf32>
    %cst_70 = arith.constant 0.000000e+00 : f32
    %103 = vector.broadcast %cst_70 : f32 to vector<32x8xf32>
    %104 = arith.cmpf ogt, %102, %103 : vector<32x8xf32>
    %cst_71 = arith.constant 2.000000e-01 : f32
    %105 = vector.broadcast %cst_71 : f32 to vector<32x8xf32>
    %106 = arith.mulf %105, %102 : vector<32x8xf32>
    %107 = arith.select %104, %102, %106 : vector<32x8xi1>, vector<32x8xf32>
    %cst_72 = arith.constant 0.000000e+00 : f32
    %108 = vector.shape_cast %29 : vector<32x1xi1> to vector<32x1xi1>
    %109 = vector.broadcast %108 : vector<32x1xi1> to vector<32x8xi1>
    %110 = vector.broadcast %cst_72 : f32 to vector<32x8xf32>
    %111 = arith.select %109, %107, %110 : vector<32x8xi1>, vector<32x8xf32>
    %112 = arith.truncf %111 : vector<32x8xf32> to vector<32x8xbf16>
    %c16_73 = arith.constant 16 : index
    %c20_74 = arith.constant 20 : index
    %113 = vector.load %arg11[%c16_73, %c20_74] : memref<64x28xbf16, #tpu.memory_space<vmem>>, vector<32x8xbf16>
    tpu.vector_store %arg11[%c16_73, %c20_74], %112 {strides = array<i32>} : memref<64x28xbf16, #tpu.memory_space<vmem>>, vector<32x8xbf16>,
    %c16_75 = arith.constant 16 : index
    %c0_76 = arith.constant 0 : index
    %114 = vector.load %arg11[%c16_75, %c0_76] : memref<64x28xbf16, #tpu.memory_space<vmem>>, vector<32x28xbf16>
    %c0_77 = arith.constant 0 : index
    %c0_78 = arith.constant 0 : index
    %115 = vector.load %arg8[%c0_77, %c0_78] : memref<28x128xbf16, #tpu.memory_space<vmem>>, vector<28x128xbf16>
    %cst_79 = arith.constant dense<0.000000e+00> : vector<32x128xf32>
    %116 = tpu.matmul %114, %115, %cst_79 {dimension_numbers = #tpu.dot_dimension_numbers<[1], [0], [0], [1], [0, 0, 1, 1], [], []>} : vector<32x28xbf16>, vector<28x128xbf16>, vector<32x128xf32> -> vector<32x128xf32>
    %c0_80 = arith.constant 0 : index
    %c0_81 = arith.constant 0 : index
    %117 = vector.load %arg9[%c0_80, %c0_81] : memref<1x128xf32, #tpu.memory_space<vmem>>, vector<1x128xf32>
    %118 = vector.broadcast %117 : vector<1x128xf32> to vector<32x128xf32>
    %119 = arith.addf %116, %118 : vector<32x128xf32>
    %cst_82 = arith.constant 0.000000e+00 : f32
    %120 = vector.broadcast %cst_82 : f32 to vector<32x128xf32>
    %121 = arith.cmpf ogt, %119, %120 : vector<32x128xf32>
    %cst_83 = arith.constant 2.000000e-01 : f32
    %122 = vector.broadcast %cst_83 : f32 to vector<32x128xf32>
    %123 = arith.mulf %122, %119 : vector<32x128xf32>
    %124 = arith.select %121, %119, %123 : vector<32x128xi1>, vector<32x128xf32>
    %125 = vector.extract_strided_slice %124 {offsets = [8, 0], sizes = [16, 128], strides = [1, 1]} : vector<32x128xf32> to vector<16x128xf32>
    %c0_84 = arith.constant 0 : index
    %c0_85 = arith.constant 0 : index
    %c0_86 = arith.constant 0 : index
    %126 = vector.load %arg10[%c0_84, %c0_85, %c0_86] : memref<1x16x128xf32, #tpu.memory_space<vmem>>, vector<1x16x128xf32>
    %127 = vector.shape_cast %126 : vector<1x16x128xf32> to vector<16x128xf32>
    %128 = vector.shape_cast %125 : vector<16x128xf32> to vector<1x16x128xf32>
    tpu.vector_store %arg10[%c0_84, %c0_85, %c0_86], %128 {strides = array<i32>} : memref<1x16x128xf32, #tpu.memory_space<vmem>>, vector<1x16x128xf32>,
    return
  }
  func.func @transform_0(%arg0: i32) -> (i32, i32, i32) {
    %c0_i32 = arith.constant 0 : i32
    %c0_i32_0 = arith.constant 0 : i32
    %c0_i32_1 = arith.constant 0 : i32
    return %arg0, %c0_i32, %c0_i32_0 : i32, i32, i32
  }
  func.func @transform_1(%arg0: i32) -> (i32, i32, i32) {
    %c0_i32 = arith.constant 0 : i32
    %c0_i32_0 = arith.constant 0 : i32
    %c0_i32_1 = arith.constant 0 : i32
    %c0_i32_2 = arith.constant 0 : i32
    return %c0_i32, %c0_i32_0, %c0_i32_1 : i32, i32, i32
  }
  func.func @transform_2(%arg0: i32) -> (i32, i32) {
    %c0_i32 = arith.constant 0 : i32
    %c0_i32_0 = arith.constant 0 : i32
    %c0_i32_1 = arith.constant 0 : i32
    return %c0_i32, %c0_i32_0 : i32, i32
  }
  func.func @transform_3(%arg0: i32) -> (i32, i32, i32) {
    %c0_i32 = arith.constant 0 : i32
    %c0_i32_0 = arith.constant 0 : i32
    %c0_i32_1 = arith.constant 0 : i32
    %c0_i32_2 = arith.constant 0 : i32
    return %c0_i32, %c0_i32_0, %c0_i32_1 : i32, i32, i32
  }
  func.func @transform_4(%arg0: i32) -> (i32, i32) {
    %c0_i32 = arith.constant 0 : i32
    %c0_i32_0 = arith.constant 0 : i32
    %c0_i32_1 = arith.constant 0 : i32
    return %c0_i32, %c0_i32_0 : i32, i32
  }
  func.func @transform_5(%arg0: i32) -> (i32, i32, i32) {
    %c0_i32 = arith.constant 0 : i32
    %c0_i32_0 = arith.constant 0 : i32
    %c0_i32_1 = arith.constant 0 : i32
    %c0_i32_2 = arith.constant 0 : i32
    return %c0_i32, %c0_i32_0, %c0_i32_1 : i32, i32, i32
  }
  func.func @transform_6(%arg0: i32) -> (i32, i32) {
    %c0_i32 = arith.constant 0 : i32
    %c0_i32_0 = arith.constant 0 : i32
    %c0_i32_1 = arith.constant 0 : i32
    return %c0_i32, %c0_i32_0 : i32, i32
  }
  func.func @transform_7(%arg0: i32) -> (i32, i32) {
    %c0_i32 = arith.constant 0 : i32
    %c0_i32_0 = arith.constant 0 : i32
    %c0_i32_1 = arith.constant 0 : i32
    return %c0_i32, %c0_i32_0 : i32, i32
  }
  func.func @transform_8(%arg0: i32) -> (i32, i32) {
    %c0_i32 = arith.constant 0 : i32
    %c0_i32_0 = arith.constant 0 : i32
    %c0_i32_1 = arith.constant 0 : i32
    return %c0_i32, %c0_i32_0 : i32, i32
  }
  func.func @transform_9(%arg0: i32) -> (i32, i32, i32) {
    %c0_i32 = arith.constant 0 : i32
    %c0_i32_0 = arith.constant 0 : i32
    %c0_i32_1 = arith.constant 0 : i32
    return %arg0, %c0_i32, %c0_i32_0 : i32, i32, i32
  }
}

</mosaic_0001>

<bundles_post_ra>
// kernel: tpu_custom_call.1
= control target key start
LH: loop header
LB: loop body
LE: loop exit
PB: predicated region body
PF: predicated region fallthrough
CT: control target
= control target key end

     0   :  { %14 = vsyncpa [#allocation4], 0  ;;  %s1952_s0 = inlined_call_operand.vmem [shape: f32[2,16,4], index: 0, kind: input, shape index: {}]   ;;  %s1953_s1 = inlined_call_operand.vmem [shape: bf16[3,4,8], index: 1, kind: input, shape index: {}]   ;;  %s1954_s2 = inlined_call_operand.vmem [shape: f32[1,8], index: 2, kind: input, shape index: {}]   ;;  %s1955_s3 = inlined_call_operand.vmem [shape: bf16[3,12,8], index: 3, kind: input, shape index: {}]   ;;  %s1956_s4 = inlined_call_operand.vmem [shape: f32[1,8], index: 4, kind: input, shape index: {}]   ;;  %s1957_s5 = inlined_call_operand.vmem [shape: bf16[3,20,8], index: 5, kind: input, shape index: {}]   ;;  %s1958_s6 = inlined_call_operand.vmem [shape: f32[1,8], index: 6, kind: input, shape index: {}]   ;;  %s1959_s7 = inlined_call_operand.vmem [shape: bf16[28,128], index: 7, kind: input, shape index: {}]   ;;  %s1960_s8 = inlined_call_operand.vmem [shape: f32[1,128], index: 8, kind: input, shape index: {}]   ;;  %s1961_s9 = inlined_call_operand.hbm [shape: f32[2,16,128], index: 9, kind: output, shape index: {}]  }
   0x1   :  { %16 = vsyncpa [#allocation4 + $0x1], 0  ;;  %s1741_s30 = smov 0   ;;  %s1743_s10 = smov 0  }
   0x2   :  { %s1745_s11 = smov 0   ;;  %s1747_s12 = smov 0  }
   0x3 LB: > { %s1762_s13 = sadd.s32 4294967295, %s1681_s12   ;;  %s1389_s14 = sadd.s32 4294967294, %s1681_s12   ;;  %s1681_s12 = sphi %s1747_s12, %s1967_s12   ;;  %s1677_s11 = sphi %s1745_s11, %s1966_s11   ;;  %s1673_s10 = sphi %s1743_s10, %s1965_s10   ;;  %s1669_s30 = sphi %s1741_s30, %s1964_s30  }
   0x4   : > { %s1766_s15 = sadd.s32 1, %s1681_s12   ;;  %s223_s16 = sadd.s32 1, %s1677_s11 }
   0x5   : > { %s220_s17 = ssub.s32 %s1681_s12, %s1766_s15  ;;  %p233_p0 = scmp.ne.s32.totalorder %s1677_s11, %s1673_s10 }
   0x6   : > { %p221_p1 = scmp.eq.s32.totalorder %s220_s17, 0  ;;  %p234_p2 = scmp.eq.s32.totalorder %s1762_s13, 1 }
   0x7   : > { %p239_p3 = scmp.ne.s32.totalorder %s1673_s10, %s1669_s30  ;;  %p240_p4 = scmp.eq.s32.totalorder %s1389_s14, 1 }
   0x8   : > { %s1777_s18 = scalar_select %p221_p1, %s1677_s11, %s223_s16  }
   0x9   : > { %p1779_p5 = por %p234_p2, %p233_p0  ;;  %p1783_p6 = por %p240_p4, %p239_p3 }
   0xa   : > { %p1392_p7 = scmp.ge.s32.totalorder %s1681_s12, 1  ;;  %p290_p8 = scmp.lt.s32.totalorder %s1681_s12, 3 }
   0xc   : > { %p291_p9 = pnand %p1392_p7, %p290_p8 }
   0xd   : > { %v1396_v0 = vld [vmem:[%s1953_s1 + $0x2] sm:$0x3] (!%p291_p9)  ;;  %vm424_vm0 = vcmask (!%p291_p9), 1041408   ;;  %p326_p10 = scmp.lt.s32.totalorder (!%p291_p9), %s1762_s13, 1  ;;  %vm332_vm1 = vcmask (!%p291_p9), 27648   ;;  %v1683_v2 = vmov (!%p291_p9), 0  }
   0xe   : > { %294 = sbr.rel (%p291_p9) target bundleno = 1349 (0x545), region = 56  ;;  %1552 = vmatprep.subr.msk.bf16.mxu0 (!%p291_p9), %vm424_vm0, %v1396_v0  ;;  %v426_v1 = vsel (!%p291_p9), %vm424_vm0, %v1396_v0, 0  ;;  %333 = vst.msk [vmem:[#allocation2 + $0x8] sm:$0xf] (!%p291_p9), %vm332_vm1, %v1683_v2  ;;  %vm340_vm2 = vcmask (!%p291_p9), 31748   ;;  %vm417_vm3 = vcmask (!%p291_p9), 31744  }
   0xf   : > { %v1401_v3 = vld [vmem:[%s1953_s1 + $0x4] sm:$0x3] (!%p291_p9)  ;;  %1485 = vmatpush3.bf16.msra.mxu0 (!%p291_p9), %v426_v1  ;;  %343 = vst.msk [vmem:[#allocation2 + $0x10] sm:$0xf0] (!%p291_p9), %vm340_vm2, %v1683_v2  ;;  %v414_v4 = vld [vmem:[%s1953_s1] sm:$0x3] (!%p291_p9) }
  0x10   : > { %1554 = vmatprep.subr.msk.bf16.mxu0 (!%p291_p9), %vm424_vm0, %v1401_v3  ;;  %1553 = vmatprep.subr.msk.bf16.mxu1 (!%p291_p9), %vm424_vm0, %v414_v4  ;;  %v503_v5 = vsel (!%p291_p9), %vm424_vm0, %v414_v4, 0  ;;  %v410_v10 = vld [vmem:[#allocation2] sm:$0x80] (!%p291_p9)  ;;  %v413_v11 = vld [vmem:[#allocation2 + $0x18] sm:$0x1] (!%p291_p9)  ;;  %v574_v16 = vsel (!%p291_p9), %vm424_vm0, %v1401_v3, 0 }
  0x11   : > { %1491 = vmatpush3.bf16.msra.mxu1 (!%p291_p9), %v503_v5  ;;  %v479_v12 = vshrl.u32 (!%p291_p9), %v410_v10, 16  ;;  %v563_v13 = vshll.u32 (!%p291_p9), %v413_v11, 16  ;;  %vm477_vm4 = vsmask.f32 (!%p291_p9), 256  ;;  %vm556_vm5 = vsmask.f32 (!%p291_p9), 7424 }
  0x12   : > { %v1404_v42 = vld [vmem:[%s1954_s2] ss:$0 sm:$0xff] (!%p291_p9)  ;;  %v1608_v46 = vld [vmem:[%s1955_s3 + $0x8] sm:$0x3f] (!%p291_p9)   ;;  %vm700_vm6 = vcmask (!%p291_p9), 1045504   ;;  %v1684_v61 = vmov (!%p291_p9), 0.0  }
  0x13   : > { %v481_v21 = vrot.slane (!%p291_p9), %v479_v12, 7  ;;  %v565_v22 = vrot.slane (!%p291_p9), %v563_v13, 1  ;;  %1555 = vmatprep.subr.msk.bf16.mxu1 (!%p291_p9), %vm700_vm6, %v1608_v46  ;;  %v702_v54 = vsel (!%p291_p9), %vm700_vm6, %v1608_v46, 0  ;;  %v1609_v58 = vld [vmem:[%s1955_s3] sm:$0x3f] (!%p291_p9)   ;;  %vm673_vm9 = vcmask (!%p291_p9), 97312  }
  0x14   : > { %v774_v60 = vsel (!%p291_p9), %vm700_vm6, %v1609_v58, 0  ;;  %v1610_v63 = vld [vmem:[%s1955_s3 + $0x10] sm:$0x3f] (!%p291_p9)   ;;  %v677_v4 = vld [vmem:[#allocation2] sm:$0x80] (!%p291_p9)  ;;  %vm693_vm10 = vcmask (!%p291_p9), 97280  }
  0x15   : > { %s327_s25 = scalar_select %p326_p10, %s1762_s13, 1  ;;  %v757_v5 = vrot.slane %v677_v4, 7  ;;  %vm756_vm11 = vcmask 1040384   ;;  %v849_v10 = vsel %vm700_vm6, %v1610_v63, 0  ;;  %vm831_vm12 = vcmask 1046528  }
  0x16   : > { %v1614_v46 = vld [vmem:[%s1957_s5 + $0x8] ss:$0 sps:$4 sm:$0x33]   ;;  %s1686_s29 = smov 12   ;;  %vm940_vm15 = vcmask 162912   ;;  %s1687_s26 = smov 20  }
  0x17   : > { %s1448_s28 = sshll.u32 %s327_s25, 4  ;;  %v949_v4 = vld [vmem:[#allocation2 + $0x18] sm:$0x3]  ;;  %s323_s27 = sand.u32 1, %s1673_s10  }
  0x18   : > { %s330_s16 = scalar_lea.vmem %s1952_s0, %s1448_s28  ;;  %s1685_s28 = smov 4  }
  0x19   : > { %v334_v6 = vld [vmem:[%s330_s16] sm:$0xff]  ;;  %v335_v7 = vld [vmem:[%s330_s16 + $0x8] sm:$0xff]  ;;  %s1393_s14 = sshll.u32 %s323_s27, 4  ;;  %s1449_s21 = sshll.u32 %s1762_s13, 8 }
  0x1a   : > { %v336_v8 = vpack.c.bf16 %v335_v7, %v334_v6  ;;  %s325_s16 = scalar_lea.vmem [#allocation3], %s1393_s14  ;;  %s1909_s24 = scalar_lea.hbm %s1961_s9, %s1449_s21 }
  0x1b   : > { %s1327_s17 = sshll.u32 %s325_s16, 4  ;;  %s1911_s25 = scalar_lea.sflag [#allocation4], %s323_s27  ;;  %s1904_s17 = int_to_ptr.vmem [resolvable:$true] %s1327_s17 }
  0x1c   : > { %v338_v9 = vrot.slane %v336_v8, 4  ;;  %s1619_s13 = scalar_lea.vmem %s1904_s17, 256 }
  0x1d   : > { %p1620_p11 = scmp.ne.s32.totalorder %s1904_s17, %s1619_s13 }
  0x1e   : > { %341 = vst.msk [vmem:[#allocation2 + $0x8] sm:$0xf0] %vm340_vm2, %v338_v9 }
  0x1f   : > { %342 = vst.msk [vmem:[#allocation2 + $0x10] sm:$0xf] %vm332_vm1, %v338_v9  ;;  %vm966_vm1 = vcmask 162816   ;;  %p1621_p12 = pnand %p1620_p11, %p1779_p5 }
  0x21   : > { %p1622_p13 = pneg %p1621_p12 }
  0x25   : > { %v411_v14 = vld [vmem:[#allocation2 + $0x8] sm:$0xff] }
  0x26   : > { %v412_v15 = vld [vmem:[#allocation2 + $0x10] sm:$0xff]  ;;  %1486 = vmatprep.mubr.msk.bf16.mxu0 %vm417_vm3, %v411_v14  ;;  %v482_v17 = vshrl.u32 %v411_v14, 16  ;;  %v485_v20 = vshll.u32 %v411_v14, 16 }
  0x27   : > { %v489_v18 = vshrl.u32 %v412_v15, 16  ;;  %v492_v19 = vshll.u32 %v412_v15, 16  ;;  %1487 = vmatmul.mubr.msk.bf16.vlgmr.msra.gmra.mrb[0].mxu0 %vm417_vm3, %v412_v15 }
  0x28   : > { %1497 = vmatpush3.bf16.msra.mxu0 %v574_v16  ;;  %v484_v24 = vrot.slane %v482_v17, 7  ;;  %v557_v25 = vrot.slane %v485_v20, 1  ;;  %v682_v16 = vld [vmem:[#allocation2 + $0x18] sm:$0x1] }
  0x29   : > { %v491_v23 = vrot.slane %v489_v18, 7  ;;  %v559_v26 = vrot.slane %v492_v19, 1  ;;  %1556 = vmatprep.subr.msk.bf16.mxu0 %vm700_vm6, %v1609_v58 }
  0x2a   : > { %v487_v27 = vor.u32 %v485_v20, %v484_v24  ;;  %v558_v29 = vor.u32 %v557_v25, %v482_v17 }
  0x2b   : > { %v494_v28 = vor.u32 %v492_v19, %v491_v23  ;;  %v561_v30 = vor.u32 %v559_v26, %v489_v18  ;;  %v835_v19 = vrot.slane %v682_v16, 1 }
  0x2c   : > { %v488_v31 = vsel %vm477_vm4, %v481_v21, %v487_v27  ;;  %v560_v33 = vsel %vm556_vm5, %v558_v29, %v559_v26 }
  0x2d   : > { %v495_v32 = vsel %vm477_vm4, %v484_v24, %v494_v28  ;;  %v566_v34 = vsel %vm556_vm5, %v561_v30, %v565_v22  ;;  %1492 = vmatprep.mubr.msk.bf16.mxu1 %vm417_vm3, %v488_v31  ;;  %1498 = vmatprep.mubr.msk.bf16.mxu0 %vm417_vm3, %v560_v33  ;;  %v1418_v31 = vld [vmem:[%s1956_s4] ss:$0 sm:$0xff]  ;;  %v1611_v33 = vld [vmem:[%s1957_s5 + $0xc] sm:$0xff]   ;;  %vm1248_vm4 = vcmask 228352  }
  0x2e   : > { %1493 = vmatmul.mubr.msk.bf16.vlgmr.msra.gmra.mrb[0].mxu1 %vm417_vm3, %v495_v32 }
  0x2f   : > { %1499 = vmatmul.mubr.msk.bf16.vlgmr.msra.gmra.mrb[4].mxu0 %vm417_vm3, %v566_v34  ;;  %1503 = vmatpush3.bf16.msra.mxu1 %v702_v54  ;;  %vm1221_vm3 = vcmask 228512  }
  0x30   : > { %1509 = vmatpush3.bf16.msra.mxu0 %v774_v60  ;;  %1557 = vmatprep.subr.msk.bf16.mxu1 %vm700_vm6, %v1610_v63 }
  0x31   : > { %1520 = vmatprep.subr.bf16.mxu0 %v1611_v33 }
  0xfa   : > { %v1488_v35 = vpop.f32.mrb[0].mxu0 }
  0xfb   : > { %v462_v36 = vpop.f32.mrb[1].mxu0 }
  0xfc   : > { %v1489_v37 = vpop.f32.mrb[2].mxu0 }
  0xfd   : > { %v465_v38 = vpop.f32.mrb[3].mxu0 }
 0x101   : > { %v1494_v39 = vpop.f32.mrb[0].mxu1 }
 0x102   : > { %v548_v40 = vadd.f32 %v1494_v39, %v1488_v35  ;;  %v539_v41 = vpop.f32.mrb[1].mxu1  ;;  %v1500_v43 = vpop.f32.mrb[4].mxu0 }
 0x103   : > { %v1495_v44 = vpop.f32.mrb[2].mxu1  ;;  %v610_v45 = vpop.f32.mrb[5].mxu0  ;;  %v1613_v41 = vld [vmem:[%s1957_s5] sm:$0xff]  }
 0x104   : > { %v627_v47 = vadd.f32 %v1500_v43, %v548_v40  ;;  %v542_v48 = vpop.f32.mrb[3].mxu1  ;;  %v1501_v49 = vpop.f32.mrb[6].mxu0  ;;  %v1612_v40 = vld [vmem:[%s1957_s5 + $0x14] ss:$0 sps:$4 sm:$0x33]  }
 0x105   : > { %v543_v50 = vadd.f32 %v542_v48, %v465_v38  ;;  %v613_v51 = vpop.f32.mrb[7].mxu0  ;;  %v974_v43 = vsel %vm424_vm0, %v1612_v40, 0  ;;  %v1615_v48 = vld [vmem:[%s1957_s5 + $0x18] sm:$0xff]  }
 0x106   : > { %v637_v52 = vadd.f32 %v1404_v42, %v627_v47 }
 0x107   : > { %v626_v53 = vadd.f32 %v613_v51, %v543_v50  ;;  %v1050_v50 = vsel %vm424_vm0, %v1614_v46, 0 }
 0x108   : > { %v645_v56 = vmul.f32 0.2, %v637_v52  ;;  %vm641_vm8 = vcmp.gt.f32.partialorder %v637_v52, 0.0 }
 0x109   : > { %v636_v55 = vadd.f32 %v1404_v42, %v626_v53 }
 0x10a   : > { %v649_v0 = vsel %vm641_vm8, %v637_v52, %v645_v56 }
 0x10b   : > { %vm640_vm7 = vcmp.gt.f32.partialorder %v636_v55, 0.0  ;;  %v644_v57 = vmul.f32 0.2, %v636_v55  ;;  %v664_v1 = vpack.c.bf16 %v1684_v61, %v649_v0 }
 0x10d   : > { %v648_v59 = vsel %vm640_vm7, %v636_v55, %v644_v57  ;;  %v944_v55 = vld [vmem:[#allocation2] sm:$0xc0] }
 0x10e   : > { %v663_v62 = vpack.c.bf16 %v648_v59, %v1684_v61  ;;  %v1029_v56 = vrot.slane %v944_v55, 6 }
 0x110   : > { %667 = vrot.lane.b32.xlu0 %v663_v62, %s1685_s28  ;;  %v1616_v62 = vld [vmem:[%s1957_s5 + $0x20] ss:$0 sps:$4 sm:$0x33]  }
 0x114   : > { %669 = vrot.lane.b32.xlu0 %v664_v1, %s1685_s28 }
 0x182   : > { %v668_v2 = vpop.permute.xlu0 %667 }
 0x183   : > { %674 = vst.msk [vmem:[#allocation2 + $0x8] sm:$0xff] %vm673_vm9, %v668_v2 }
 0x186   : > { %v670_v3 = vpop.permute.xlu0 %669 }
 0x187   : > { %675 = vst.msk [vmem:[#allocation2 + $0x10] sm:$0xff] %vm673_vm9, %v670_v3 }
 0x18a   : > { %v678_v6 = vld [vmem:[#allocation2 + $0x8] sm:$0xff] }
 0x18b   : > { %1504 = vmatprep.mubr.msk.bf16.mxu1 %vm693_vm10, %v678_v6  ;;  %v758_v7 = vrot.slane %v678_v6, 7  ;;  %v681_v8 = vld [vmem:[#allocation2 + $0x8] sm:$0xfe] }
 0x18c   : > { %v832_v14 = vrot.slane %v681_v8, 1  ;;  %v1112_v8 = vrot.slane %v949_v4, 2 }
 0x18d   : > { %v759_v9 = vsel %vm756_vm11, %v757_v5, %v758_v7 }
 0x18e   : > { %1510 = vmatprep.mubr.msk.bf16.mxu0 %vm693_vm10, %v759_v9  ;;  %v680_v11 = vld [vmem:[#allocation2 + $0x10] sm:$0xff] }
 0x18f   : > { %v679_v12 = vld [vmem:[#allocation2 + $0x10] sm:$0x7f]  ;;  %1505 = vmatmul.mubr.msk.bf16.vlgmr.msra.gmra.mrb[4].mxu1 %vm693_vm10, %v680_v11  ;;  %v833_v15 = vrot.slane %v680_v11, 1 }
 0x190   : > { %v760_v13 = vrot.slane %v679_v12, 7  ;;  %1515 = vmatpush3.bf16.msra.mxu1 %v849_v10 }
 0x191   : > { %v834_v18 = vsel %vm831_vm12, %v832_v14, %v833_v15  ;;  %v836_v20 = vsel %vm831_vm12, %v833_v15, %v835_v19  ;;  %1528 = vmatprep.subr.bf16.mxu1 %v1613_v41 }
 0x192   : > { %v761_v17 = vsel %vm756_vm11, %v758_v7, %v760_v13  ;;  %1516 = vmatprep.mubr.msk.bf16.mxu1 %vm693_vm10, %v834_v18  ;;  %v1130_v7 = vsel %vm424_vm0, %v1616_v62, 0 }
 0x193   : > { %1511 = vmatmul.mubr.msk.bf16.vlgmr.msra.gmra.mrb[8].mxu0 %vm693_vm10, %v761_v17 }
 0x194   : > { %1521 = vmatpush3.bf16.msra.mxu0 %v1611_v33 }
 0x195   : > { %1558 = vmatprep.subr.msk.bf16.mxu0 %vm424_vm0, %v1612_v40 }
 0x197   : > { %1517 = vmatmul.mubr.msk.bf16.vlgmr.msra.gmra.mrb[8].mxu1 %vm693_vm10, %v836_v20  ;;  %v1617_v20 = vld [vmem:[%s1959_s7] sm:$0xff]  }
 0x198   : > { %1523 = vmatpush3.bf16.msra.mxu0 %v974_v43  ;;  %1529 = vmatpush3.bf16.msra.mxu1 %v1613_v41 }
 0x199   : > { %1559 = vmatprep.subr.msk.bf16.mxu1 %vm424_vm0, %v1614_v46  ;;  %1536 = vmatprep.subr.bf16.mxu0 %v1615_v48 }
 0x19c   : > { %1531 = vmatpush3.bf16.msra.mxu1 %v1050_v50 }
 0x19d   : > { %1544 = vmatprep.subr.bf16.mxu1 %v1617_v20 }
 0x262   : > { %v1506_v21 = vpop.f32.mrb[4].mxu1 }
 0x263   : > { %v738_v22 = vpop.f32.mrb[5].mxu1 }
 0x264   : > { %v1507_v23 = vpop.f32.mrb[6].mxu1 }
 0x265   : > { %v741_v24 = vpop.f32.mrb[7].mxu1  ;;  %v1618_v23 = vld [vmem:[%s1959_s7 + $0x8] sm:$0x3f]  }
 0x266   : > { %v1512_v25 = vpop.f32.mrb[8].mxu0 }
 0x267   : > { %v819_v26 = vadd.f32 %v1512_v25, %v1506_v21  ;;  %v810_v27 = vpop.f32.mrb[9].mxu0  ;;  %v1437_v21 = vld [vmem:[%s1958_s6] ss:$0 sm:$0xff] }
 0x268   : > { %v1513_v28 = vpop.f32.mrb[10].mxu0 }
 0x269   : > { %v813_v29 = vpop.f32.mrb[11].mxu0 }
 0x26a   : > { %v814_v30 = vadd.f32 %v813_v29, %v741_v24  ;;  %v1518_v32 = vpop.f32.mrb[8].mxu1  ;;  %v1256_v29 = vsel %vm700_vm6, %v1618_v23, 0 }
 0x26b   : > { %v902_v34 = vadd.f32 %v1518_v32, %v819_v26  ;;  %v885_v35 = vpop.f32.mrb[9].mxu1 }
 0x26c   : > { %v1519_v36 = vpop.f32.mrb[10].mxu1 }
 0x26d   : > { %v912_v37 = vadd.f32 %v1418_v31, %v902_v34  ;;  %v888_v38 = vpop.f32.mrb[11].mxu1 }
 0x26e   : > { %v901_v39 = vadd.f32 %v888_v38, %v814_v30 }
 0x26f   : > { %v920_v44 = vmul.f32 0.2, %v912_v37  ;;  %vm916_vm14 = vcmp.gt.f32.partialorder %v912_v37, 0.0 }
 0x270   : > { %v911_v42 = vadd.f32 %v1418_v31, %v901_v39 }
 0x271   : > { %v924_v51 = vsel %vm916_vm14, %v912_v37, %v920_v44 }
 0x272   : > { %vm915_vm13 = vcmp.gt.f32.partialorder %v911_v42, 0.0  ;;  %v919_v45 = vmul.f32 0.2, %v911_v42  ;;  %v931_v52 = vpack.c.bf16 %v1684_v61, %v924_v51 }
 0x274   : > { %v923_v47 = vsel %vm915_vm13, %v911_v42, %v919_v45  ;;  %v1438_v42 = vld [vmem:[%s1960_s8] ss:$0 sm:$0xff] }
 0x275   : > { %v930_v49 = vpack.c.bf16 %v923_v47, %v1684_v61 }
 0x277   : > { %934 = vrot.lane.b32.xlu1 %v930_v49, %s1686_s29 }
 0x27b   : > { %936 = vrot.lane.b32.xlu1 %v931_v52, %s1686_s29 }
 0x2e9   : > { %v935_v53 = vpop.permute.xlu1 %934 }
 0x2ea   : > { %941 = vst.msk [vmem:[#allocation2 + $0x8] sm:$0xff] %vm940_vm15, %v935_v53 }
 0x2ed   : > { %v937_v54 = vpop.permute.xlu1 %936 }
 0x2ee   : > { %942 = vst.msk [vmem:[#allocation2 + $0x10] sm:$0xff] %vm940_vm15, %v937_v54 }
 0x2f1   : > { %v945_v57 = vld [vmem:[#allocation2 + $0x8] sm:$0xff] }
 0x2f2   : > { %1524 = vmatprep.mubr.msk.bf16.mxu0 %vm966_vm1, %v945_v57  ;;  %v1030_v58 = vrot.slane %v945_v57, 6  ;;  %v948_v59 = vld [vmem:[#allocation2 + $0x8] sm:$0xfc] }
 0x2f3   : > { %v1109_v2 = vrot.slane %v948_v59, 2 }
 0x2f4   : > { %v1031_v60 = vsel %vm424_vm0, %v1029_v56, %v1030_v58 }
 0x2f5   : > { %1532 = vmatprep.mubr.msk.bf16.mxu1 %vm966_vm1, %v1031_v60  ;;  %v947_v63 = vld [vmem:[#allocation2 + $0x10] sm:$0xff] }
 0x2f6   : > { %v946_v0 = vld [vmem:[#allocation2 + $0x10] sm:$0x3f]  ;;  %1525 = vmatmul.mubr.msk.bf16.vlgmr.msra.gmra.mrb[12].mxu0 %vm966_vm1, %v947_v63  ;;  %v1110_v3 = vrot.slane %v947_v63, 2 }
 0x2f7   : > { %v1032_v1 = vrot.slane %v946_v0, 6  ;;  %1537 = vmatpush3.bf16.msra.mxu0 %v1615_v48 }
 0x2f8   : > { %1560 = vmatprep.subr.msk.bf16.mxu0 %vm424_vm0, %v1616_v62  ;;  %v1111_v6 = vsel %vm700_vm6, %v1109_v2, %v1110_v3  ;;  %v1113_v9 = vsel %vm700_vm6, %v1110_v3, %v1112_v8 }
 0x2f9   : > { %v1033_v5 = vsel %vm424_vm0, %v1030_v58, %v1032_v1  ;;  %1540 = vmatprep.mubr.msk.bf16.mxu0 %vm966_vm1, %v1111_v6 }
 0x2fa   : > { %1533 = vmatmul.mubr.msk.bf16.vlgmr.msra.gmra.mrb[12].mxu1 %vm966_vm1, %v1033_v5 }
 0x2fb   : > { %1539 = vmatpush3.bf16.msra.mxu0 %v1130_v7  ;;  %1545 = vmatpush3.bf16.msra.mxu1 %v1617_v20 }
 0x2fc   : > { %1561 = vmatprep.subr.msk.bf16.mxu1 %vm700_vm6, %v1618_v23 }
 0x2fe   : > { %1541 = vmatmul.mubr.msk.bf16.vlgmr.msra.gmra.mrb[16].mxu0 %vm966_vm1, %v1113_v9 }
 0x2ff   : > { %1547 = vmatpush3.bf16.msra.mxu1 %v1256_v29 }
 0x3c9   : > { %v1526_v10 = vpop.f32.mrb[12].mxu0 }
 0x3ca   : > { %v1010_v11 = vpop.f32.mrb[13].mxu0 }
 0x3cb   : > { %v1527_v12 = vpop.f32.mrb[14].mxu0 }
 0x3cc   : > { %v1013_v13 = vpop.f32.mrb[15].mxu0 }
 0x3cd   : > { %v1534_v14 = vpop.f32.mrb[12].mxu1 }
 0x3ce   : > { %v1095_v15 = vadd.f32 %v1534_v14, %v1526_v10  ;;  %v1086_v16 = vpop.f32.mrb[13].mxu1 }
 0x3cf   : > { %v1535_v17 = vpop.f32.mrb[14].mxu1 }
 0x3d0   : > { %v1089_v18 = vpop.f32.mrb[15].mxu1 }
 0x3d1   : > { %v1090_v19 = vadd.f32 %v1089_v18, %v1013_v13  ;;  %v1542_v22 = vpop.f32.mrb[16].mxu0 }
 0x3d2   : > { %v1183_v24 = vadd.f32 %v1542_v22, %v1095_v15  ;;  %v1166_v25 = vpop.f32.mrb[17].mxu0 }
 0x3d3   : > { %v1543_v26 = vpop.f32.mrb[18].mxu0 }
 0x3d4   : > { %v1193_v27 = vadd.f32 %v1437_v21, %v1183_v24  ;;  %v1169_v28 = vpop.f32.mrb[19].mxu0 }
 0x3d5   : > { %v1182_v30 = vadd.f32 %v1169_v28, %v1090_v19 }
 0x3d6   : > { %vm1197_vm0 = vcmp.gt.f32.partialorder %v1193_v27, 0.0  ;;  %v1201_v31 = vmul.f32 0.2, %v1193_v27 }
 0x3d7   : > { %v1192_v32 = vadd.f32 %v1437_v21, %v1182_v30 }
 0x3d8   : > { %v1205_v33 = vsel %vm1197_vm0, %v1193_v27, %v1201_v31 }
 0x3d9   : > { %vm1196_vm2 = vcmp.gt.f32.partialorder %v1192_v32, 0.0  ;;  %v1200_v34 = vmul.f32 0.2, %v1192_v32  ;;  %v1212_v35 = vpack.c.bf16 %v1684_v61, %v1205_v33 }
 0x3db   : > { %1217 = vrot.lane.b32.xlu1 %v1212_v35, %s1687_s26  ;;  %v1204_v36 = vsel %vm1196_vm2, %v1192_v32, %v1200_v34 }
 0x3dc   : > { %v1211_v37 = vpack.c.bf16 %v1204_v36, %v1684_v61 }
 0x3de   : > { %1215 = vrot.lane.b32.xlu0 %v1211_v37, %s1687_s26  ;;  %s1688_s26 = smov [#allocation3]  }
 0x3df   : > { %s1623_s28 = sshll.u32 %s1688_s26, 4  ;;  %s1624_s28 = int_to_ptr.vmem [resolvable:$false] %s1623_s28 }
 0x3e0   : > { %s1625_s29 = scalar_lea.vmem %s1624_s28, 512  ;;  %p1626_p0 = scmp.lt.s32.totalorder %s1904_s17, %s1624_s28 }
 0x3e1   : > { %p1627_p1 = scmp.lt.s32.totalorder %s1625_s29, %s1619_s13 }
 0x3e3   : > { %p1628_p2 = por %p1627_p1, %p1626_p0 }
 0x3e5   : > { %p1629_p3 = pnand %p1628_p2, %p1622_p13 }
 0x44d   : > { %v1218_v38 = vpop.permute.xlu1 %1217 }
 0x44e   : > { %1223 = vst.msk [vmem:[#allocation2 + $0x10] sm:$0xff] %vm1221_vm3, %v1218_v38 }
 0x450   : > { %v1216_v39 = vpop.permute.xlu0 %1215 }
 0x451   : > { %1222 = vst.msk [vmem:[#allocation2 + $0x8] sm:$0xff] %vm1221_vm3, %v1216_v39 }
 0x455   : > { %v1225_v41 = vld [vmem:[#allocation2 + $0x10] sm:$0xff] }
 0x458   : > { %v1224_v40 = vld [vmem:[#allocation2 + $0x8] sm:$0xff] }
 0x459   : > { %1548 = vmatprep.mubr.msk.bf16.mxu1 %vm1248_vm4, %v1224_v40 }
 0x45a   : > { %1549 = vmatmul.mubr.msk.bf16.vlgmr.msra.gmra.mrb[16].mxu1 %vm1248_vm4, %v1225_v41 }
 0x52d   : > { %v1550_v43 = vpop.f32.mrb[16].mxu1 }
 0x52e   : > { %v1300_v61 = vadd.f32 %v1550_v43, %v1438_v42  ;;  %v1292_v44 = vpop.f32.mrb[17].mxu1 }
 0x52f   : > { %v1551_v45 = vpop.f32.mrb[18].mxu1 }
 0x530   : > { %vm1306_vm5 = vcmp.gt.f32.partialorder %v1300_v61, 0.0  ;;  %v1308_v46 = vmul.f32 0.2, %v1300_v61  ;;  %v1294_v47 = vpop.f32.mrb[19].mxu1 }
 0x531   : > { %v1295_v48 = vadd.f32 %v1438_v42, %v1294_v47 }
 0x532   : > { %v1310_v49 = vsel %vm1306_vm5, %v1300_v61, %v1308_v46 }
 0x533   : > { %1312 = vst [vmem:[%s325_s16 + $0x8] sm:$0xff] %v1310_v49  ;;  %vm1305_vm6 = vcmp.gt.f32.partialorder %v1295_v48, 0.0  ;;  %v1307_v50 = vmul.f32 0.2, %v1295_v48 }
 0x535   : > { %v1309_v51 = vsel %vm1305_vm6, %v1295_v48, %v1307_v50 }
 0x536   : > { %1311 = vst [vmem:[%s325_s16] sm:$0xff] %v1309_v51 }
 0x537   : > { %1632 = shalt.err (!%p1629_p3)
}
 0x538   : > { %s1633_s27 = scalar_lea.hbm %s1909_s24, 256  ;;  %s1637_s21 = scalar_lea.hbm %s1961_s9, 512 }
 0x539   : > { %p1634_p4 = scmp.ne.s32.totalorder %s1909_s24, %s1633_s27  ;;  %p1638_p9 = scmp.lt.u32.totalorder %s1909_s24, %s1961_s9 }
 0x53a   : > { %p1639_p10 = scmp.lt.u32.totalorder %s1637_s21, %s1633_s27  ;;  %p1641_p12 = scmp.lt.u32.totalorder %s1633_s27, %s1909_s24 }
 0x53b   : > { %p1635_p7 = pnand %p1634_p4, %p1779_p5 }
 0x53c   : > { %p1640_p11 = por %p1639_p10, %p1638_p9 }
 0x53d   : > { %p1636_p8 = pneg %p1635_p7 }
 0x53e   : > { %p1642_p13 = por %p1641_p12, %p1640_p11 }
 0x540   : > { %p1643_p0 = pnand %p1642_p13, %p1636_p8 }
 0x542   : > { %1646 = shalt.err (!%p1643_p0)
}
 0x543   : > { %s1689_s13 = smov 128   ;;  %s1690_s26 = smov 8  }
 0x544   : > { %1562 = dma.vmem_to_hbm [thread:$0]  (%p1779_p5), %s1904_s17, 256, %s1909_s24, %s1911_s25, %s1689_s13, %s1689_s13, %s1690_s26  }
 0x545 PF: > { %p1568_p1 = scmp.ge.s32.totalorder %s1681_s12, 2  ;;  %s1342_s28 = sand.u32 1, %s1669_s30  }
 0x546   : > { %s1343_s29 = scalar_lea.sflag [#allocation4], %s1342_s28 }
 0x547   : > { %p1565_p2 = pnand %p1568_p1, %p1783_p6 }
 0x549   : > { %1664 = dma.done.wait (!%p1565_p2), %s1343_s29, 256  }
 0x54a   : > { %1666 = vsyncadd (!%p1565_p2), %s1343_s29, 4294967040  ;;  %p19_p3 = scmp.ge.s32.totalorder %s1766_s15, 4   ;;  %s1964_s30 = smov %s1673_s10 }
 0x54b   : > { %s1965_s10 = smov %s1677_s11  ;;  %s1966_s11 = smov %s1777_s18 }
 0x54c   : > { %s1967_s12 = smov %s1766_s15  ;;  %21 = sbr.rel (!%p19_p3) target bundleno = 3 (0x3), region = 97 }
 0x553   :  { %1348 = vsyncpa [#allocation4], 1 }
 0x554   :  { %1350 = vsyncpa [#allocation4 + $0x1], 1 }

</bundles_post_ra>
